<compile_context>
chip_gen: v7x
topology: tpu7x:2x2x1
jax: 0.10.0
libtpu: 0.0.40
codegen_flags: <defaults>
</compile_context>

<pallas_src>
import math

import jax
import jax.numpy as jnp
from jax.experimental import pallas as pl
from jax.experimental.pallas import tpu as pltpu


def _scale_kernel(scale_ref, x_ref, o_ref):
    # scale_ref: SMEM (1,) f32 scalar parameter
    # x_ref / o_ref: VMEM (TR, L) tiles of the flattened input / output
    s = scale_ref[0].astype(x_ref.dtype)          # read once, native dtype
    o_ref[...] = (x_ref[...] * s).astype(o_ref.dtype)


def scale_forward(x: jax.Array, scale: jax.Array, *,
                  lane_tile: int = 1024, row_tile: int = 1024,
                  min_pallas_elems: int = 256 * 1024,
                  donate_input: bool = False) -> jax.Array:
    """y = x * scale (scalar) via a tiled, pipelined, pad-free Pallas TPU kernel.

    x:     arbitrary-rank array (e.g. NCHW feature map), any float dtype
    scale: (1,) float32 parameter (as in nn.Parameter(torch.FloatTensor([v])))
    """
    orig_shape = x.shape
    dtype = x.dtype
    total = math.prod(orig_shape)

    # --- tiny-input bypass: fixed launch/pipeline overhead dominates ----------
    if total < min_pallas_elems:
        return (x * scale[0].astype(dtype)).astype(dtype)

    # --- lane width: largest 128-multiple <= lane_tile dividing total ---------
    # Keeps the reshape a pure layout change (no jnp.pad / no trailing slice).
    L = 0
    for cand in (lane_tile, 512, 256, 128):
        if cand % 128 == 0 and total % cand == 0:
            L = cand
            break
    if L == 0:
        # total not a multiple of 128: padding would cost a full extra HBM
        # pass; plain XLA elementwise is already at the 2-bytes/elem roofline.
        return (x * scale[0].astype(dtype)).astype(dtype)

    rows = total // L
    x2d = x.reshape(rows, L)

    # --- row tile: keep each DMA >= ~4 MiB regardless of dtype ----------------
    itemsize = jnp.dtype(dtype).itemsize
    tr = row_tile if itemsize >= 4 else row_tile * (4 // itemsize)
    tr = (tr // 8) * 8 or 8                        # keep a multiple of 8
    # For small inputs use the full row dim (block dim == full array dim is
    # always legal even if rows is not a multiple of 8).
    TR = tr if rows >= tr else rows

    grid = (pl.cdiv(rows, TR),)                    # ragged final tile is masked

    # --- right-sized scoped VMEM: in+out, double-buffered, + slack ------------
    vmem_bytes = 2 * 2 * TR * L * itemsize + (4 << 20)

    cost = pl.CostEstimate(
        flops=total,
        transcendentals=0,
        bytes_accessed=2 * total * itemsize,       # read x + write y
    )

    extra = {}
    if donate_input:
        # Alias the x2d operand (index 1) to the output: in-place update when
        # the caller no longer needs x, halving the HBM footprint.
        extra["input_output_aliases"] = {1: 0}

    out2d = pl.pallas_call(
        _scale_kernel,
        out_shape=jax.ShapeDtypeStruct((rows, L), dtype),
        grid_spec=pl.GridSpec(
            grid=grid,
            in_specs=[
                # scalar parameter -> SMEM, untiled
                pl.BlockSpec(memory_space=pltpu.MemorySpace.SMEM),
                # x tiles: (TR, L), lane dim is the full (128-aligned) width
                pl.BlockSpec((TR, L), lambda i: (i, 0)),
            ],
            out_specs=pl.BlockSpec((TR, L), lambda i: (i, 0)),
        ),
        compiler_params=pltpu.CompilerParams(
            dimension_semantics=("parallel",),
            vmem_limit_bytes=vmem_bytes,
        ),
        cost_estimate=cost,
        **extra,
    )(scale.astype(jnp.float32), x2d)

    return out2d.reshape(orig_shape)


if __name__ == "__main__":
    key = jax.random.PRNGKey(0)

    # Deterministic parameter, matching Scale(init_value=1.0) but non-trivial
    # so the multiply is actually exercised.
    scale_param = jnp.array([1.5], dtype=jnp.float32)

    # --- primary check: spec-sized FCOS head feature map, NCHW = (2,4,16,16) --
    x_small = jax.random.normal(key, (2, 4, 16, 16), dtype=jnp.float32)
    # Disable the tiny-input bypass so the Pallas kernel itself runs here.
    y_small = jax.block_until_ready(
        scale_forward(x_small, scale_param, min_pallas_elems=0))
    ref_small = x_small * scale_param[0]
    assert y_small.shape == x_small.shape and y_small.dtype == x_small.dtype
    assert jnp.allclose(y_small, ref_small, atol=1e-6, rtol=1e-6)

    # --- secondary check: multi-tile grid with a ragged final tile ------------
    key2 = jax.random.PRNGKey(0)
    x_big = jax.random.normal(key2, (2, 33, 128, 128), dtype=jnp.float32)
    y_big = jax.block_until_ready(scale_forward(x_big, scale_param))
    ref_big = x_big * scale_param[0]
    assert y_big.shape == x_big.shape and y_big.dtype == x_big.dtype
    assert jnp.allclose(y_big, ref_big, atol=1e-6, rtol=1e-6)

    print("KERNEL_OK")
</pallas_src>

<mosaic_0001>
module attributes {stable_mosaic.version = 11 : i64} {
  func.func @_scale_kernel(%arg0: i32, %arg1: memref<1xf32, #tpu.memory_space<smem>>, %arg2: memref<2x1024xf32, #tpu.memory_space<vmem>>, %arg3: memref<2x1024xf32, #tpu.memory_space<vmem>>) attributes {dimension_semantics = [#tpu.dimension_semantics<parallel>], iteration_bounds = array<i64: 1>, scalar_prefetch = 0 : i64, scratch_operands = 0 : i64, tpu.core_type = #tpu.core_type<tc>, window_params = [{transform_indices = @transform_0, window_bounds = array<i64: 1>}, {transform_indices = @transform_1, window_bounds = array<i64: 2, 1024>}, {transform_indices = @transform_2, window_bounds = array<i64: 2, 1024>}]} {
    %c0 = arith.constant 0 : index
    %0 = memref.load %arg1[%c0] : memref<1xf32, #tpu.memory_space<smem>>
    %c0_0 = arith.constant 0 : index
    %c0_1 = arith.constant 0 : index
    %1 = vector.load %arg2[%c0_0, %c0_1] : memref<2x1024xf32, #tpu.memory_space<vmem>>, vector<2x1024xf32>
    %2 = vector.broadcast %0 : f32 to vector<2x1024xf32>
    %3 = arith.mulf %1, %2 : vector<2x1024xf32>
    %c0_2 = arith.constant 0 : index
    %c0_3 = arith.constant 0 : index
    %4 = vector.load %arg3[%c0_2, %c0_3] : memref<2x1024xf32, #tpu.memory_space<vmem>>, vector<2x1024xf32>
    tpu.vector_store %arg3[%c0_2, %c0_3], %3 {strides = array<i32>} : memref<2x1024xf32, #tpu.memory_space<vmem>>, vector<2x1024xf32>,
    return
  }
  func.func @transform_0(%arg0: i32) -> i32 {
    %c0_i32 = arith.constant 0 : i32
    %c0_i32_0 = arith.constant 0 : i32
    return %c0_i32 : i32
  }
  func.func @transform_1(%arg0: i32) -> (i32, i32) {
    %c0_i32 = arith.constant 0 : i32
    %c0_i32_0 = arith.constant 0 : i32
    return %arg0, %c0_i32 : i32, i32
  }
  func.func @transform_2(%arg0: i32) -> (i32, i32) {
    %c0_i32 = arith.constant 0 : i32
    %c0_i32_0 = arith.constant 0 : i32
    return %arg0, %c0_i32 : i32, i32
  }
}

</mosaic_0001>

<bundles_post_ra>
// kernel: tpu_custom_call.1
= control target key start
LH: loop header
LB: loop body
LE: loop exit
PB: predicated region body
PF: predicated region fallthrough
CT: control target
= control target key end

     0   :  { %8 = vsyncpa [#allocation4], 0  ;;  %s142_s0 = inlined_call_operand.<no memory space> [shape: f32[1], index: 0, kind: input, shape index: {}]   ;;  %s143_s1 = inlined_call_operand.hbm [shape: f32[2,1024], index: 1, kind: input, shape index: {}]   ;;  %s144_s2 = inlined_call_operand.hbm [shape: f32[2,1024], index: 2, kind: output, shape index: {}]  }
   0x1   :  { %9 = vsyncpa [#allocation5], 0  ;;  %s98_s9 = smov [#allocation3]   ;;  %s50_s13 = scalar_lea.hbm %s143_s1, 256 }
   0x2   :  { %s18_s10 = sshll.u32 %s98_s9, 4  ;;  %p51_p0 = scmp.ne.s32.totalorder %s143_s1, %s50_s13  ;;  %s19_s10 = int_to_ptr.vmem [resolvable:$true] %s18_s10 }
   0x3   :  { %p54_p1 = scmp.lt.u32.totalorder %s50_s13, %s143_s1 }
   0x5   :  { %p56_p2 = pnand %p54_p1, %p51_p0 }
   0x7   :  { %59 = shalt.err (!%p56_p2)
}
   0x8   :  { %s60_s18 = scalar_lea.vmem %s19_s10, 256  ;;  %p65_p4 = scmp.lt.s32.totalorder %s19_s10, %s19_s10 }
   0x9   :  { %p61_p3 = scmp.ne.s32.totalorder %s19_s10, %s60_s18  ;;  %p66_p5 = scmp.lt.s32.totalorder %s60_s18, %s60_s18 }
   0xb   :  { %p67_p6 = por %p66_p5, %p65_p4 }
   0xd   :  { %p68_p7 = pnand %p67_p6, %p61_p3 }
   0xf   :  { %71 = shalt.err (!%p68_p7)
}
  0x10   :  { %21 = dma.hbm_to_vmem [thread:$0]  %s143_s1, 256, %s19_s10, [#allocation4]  }
  0x11   :  { %94 = dma.done.wait [#allocation4], 256  }
  0x12   :  { %95 = vsyncadd [#allocation4], 4294967040  ;;  %v28_v0 = vstv %s142_s0  ;;  %s99_s23 = smov [#allocation6]   ;;  %v26_v1 = vld [vmem:[#allocation3] sm:$0xff]  ;;  %v27_v2 = vld [vmem:[#allocation3 + $0x8] sm:$0xff] }
  0x13   :  { %s39_s24 = sshll.u32 %s99_s23, 4  ;;  %v29_v3 = vmul.f32 %v28_v0, %v26_v1  ;;  %v30_v4 = vmul.f32 %v28_v0, %v27_v2  ;;  %s40_s24 = int_to_ptr.vmem [resolvable:$true] %s39_s24 }
  0x14   :  { %s72_s25 = scalar_lea.vmem %s40_s24, 256  ;;  %p77_p9 = scmp.lt.s32.totalorder %s40_s24, %s40_s24 }
  0x15   :  { %31 = vst [vmem:[#allocation6] sm:$0xff] %v29_v3  ;;  %32 = vst [vmem:[#allocation6 + $0x8] sm:$0xff] %v30_v4  ;;  %p73_p8 = scmp.ne.s32.totalorder %s40_s24, %s72_s25  ;;  %p78_p10 = scmp.lt.s32.totalorder %s72_s25, %s72_s25 }
  0x17   :  { %p79_p11 = por %p78_p10, %p77_p9 }
  0x19   :  { %p80_p12 = pnand %p79_p11, %p73_p8 }
  0x1b   :  { %83 = shalt.err (!%p80_p12)
}
  0x1c   :  { %s84_s0 = scalar_lea.hbm %s144_s2, 256 }
  0x1d   :  { %p85_p13 = scmp.ne.s32.totalorder %s144_s2, %s84_s0  ;;  %p88_p0 = scmp.lt.u32.totalorder %s84_s0, %s144_s2 }
  0x1f   :  { %p90_p1 = pnand %p88_p0, %p85_p13 }
  0x21   :  { %93 = shalt.err (!%p90_p1)
}
  0x22   :  { %42 = dma.vmem_to_hbm [thread:$0]  %s40_s24, 256, %s144_s2, [#allocation5]  }
  0x23   :  { %96 = dma.done.wait [#allocation5], 256  }
  0x24   :  { %97 = vsyncadd [#allocation5], 4294967040 }
  0x25   :  { %46 = vsyncpa [#allocation4], 1 }
  0x26   :  { %47 = vsyncpa [#allocation5], 1 }

</bundles_post_ra>
